<compile_context>
chip_gen: v7x
topology: tpu7x:2x2x1
jax: 0.10.0
libtpu: 0.0.40
codegen_flags: <defaults>
</compile_context>

<pallas_src>
import jax
import jax.numpy as jnp
from jax.experimental import pallas as pl
from jax.experimental.pallas import tpu as pltpu


def _round_up(x, m):
    return ((x + m - 1) // m) * m


def _lora_kernel(x_ref, w_ref, b_ref, a_ref, bm_ref, o_ref, acc_ref, z_ref):
    # x_ref:   (tm, tk)   x tile
    # w_ref:   (tk, tn)   W^T tile
    # b_ref:   (1,  tn)   bias tile
    # a_ref:   (tk, Rp)   A^T tile (rank dim padded, untiled)
    # bm_ref:  (Rp, tn)   B^T tile
    # o_ref:   (tm, tn)   output tile
    # acc_ref: (tm, tn)   f32 accumulator for x @ W^T
    # z_ref:   (tm, Rp)   f32 accumulator for x @ A^T
    k = pl.program_id(2)

    @pl.when(k == 0)
    def _init():
        acc_ref[...] = jnp.zeros_like(acc_ref)
        z_ref[...] = jnp.zeros_like(z_ref)

    x = x_ref[...]
    acc_ref[...] += jnp.dot(x, w_ref[...], preferred_element_type=jnp.float32)
    z_ref[...] += jnp.dot(x, a_ref[...], preferred_element_type=jnp.float32)

    @pl.when(k == pl.num_programs(2) - 1)
    def _finalize():
        # Keep z in f32 for the tiny rank-R matmul (precision of the LoRA
        # correction), add bias in f32, cast once on the way out.
        lora = jnp.dot(z_ref[...], bm_ref[...].astype(jnp.float32),
                       preferred_element_type=jnp.float32)
        out = acc_ref[...] + lora + b_ref[...].astype(jnp.float32)
        o_ref[...] = out.astype(o_ref.dtype)


def lora_linear(x2d, w_t, bias2d, a_t, b_t, *, tm, tn, tk):
    """Fused y = x2d @ w_t + bias + (x2d @ a_t) @ b_t on pre-padded operands."""
    Mp, Kp = x2d.shape
    Np = w_t.shape[1]
    Rp = a_t.shape[1]
    assert Mp % tm == 0 and Kp % tk == 0 and Np % tn == 0

    grid = (Mp // tm, Np // tn, Kp // tk)

    itemsize = x2d.dtype.itemsize
    flops = 2 * Mp * Np * Kp + 2 * Mp * Rp * (Kp + Np)
    bytes_accessed = itemsize * (Mp * Kp + Kp * Np + Kp * Rp + Rp * Np
                                 + Np + Mp * Np)

    return pl.pallas_call(
        _lora_kernel,
        out_shape=jax.ShapeDtypeStruct((Mp, Np), x2d.dtype),
        grid=grid,
        in_specs=[
            pl.BlockSpec((tm, tk), lambda i, j, k: (i, k)),   # x
            pl.BlockSpec((tk, tn), lambda i, j, k: (k, j)),   # W^T
            pl.BlockSpec((1, tn), lambda i, j, k: (0, j)),    # bias
            pl.BlockSpec((tk, Rp), lambda i, j, k: (k, 0)),   # A^T
            pl.BlockSpec((Rp, tn), lambda i, j, k: (0, j)),   # B^T
        ],
        out_specs=pl.BlockSpec((tm, tn), lambda i, j, k: (i, j)),
        scratch_shapes=[
            pltpu.VMEM((tm, tn), jnp.float32),
            pltpu.VMEM((tm, Rp), jnp.float32),
        ],
        compiler_params=pltpu.CompilerParams(
            dimension_semantics=("parallel", "parallel", "arbitrary")),
        cost_estimate=pl.CostEstimate(
            flops=flops, transcendentals=0, bytes_accessed=bytes_accessed),
    )(x2d, w_t, bias2d, a_t, b_t)


class LoRAWrapperPallas:
    """JAX analogue of LoRAWrapper(original_model=Linear named 'proj', r=4).

    The 'original model' is a single nn.Linear(in_features, out_features)
    whose name matches 'proj', so LoRAWrapper replaces it with a LoRAModule:
      forward(x) = proj(x) + lora_B(lora_A(x)).
    """

    # Target tile sizes (lane-dense, MXU-friendly). Re-derived per layer size.
    TM_TARGET = 256
    TN_TARGET = 256
    TK_TARGET = 256

    def __init__(self, in_features, out_features, r, key, dtype=jnp.float32):
        self.in_features = in_features
        self.out_features = out_features
        self.r = r

        kw, kb, ka, kB = jax.random.split(key, 4)
        # Deterministic init mimicking torch Linear defaults (uniform fan-in).
        lim_w = 1.0 / float(jnp.sqrt(in_features))
        lim_b = 1.0 / float(jnp.sqrt(r))
        # Stored pre-transposed ([in, out], [in, r], [r, out]).
        self.w_t = jax.random.uniform(kw, (in_features, out_features),
                                      dtype, -lim_w, lim_w)
        self.bias = jax.random.uniform(kb, (out_features,), dtype,
                                       -lim_w, lim_w)
        self.a_t = jax.random.uniform(ka, (in_features, r), dtype,
                                      -lim_w, lim_w)
        self.b_t = jax.random.uniform(kB, (r, out_features), dtype,
                                      -lim_b, lim_b)

        # --- derive tile sizes and pre-pad weights once -------------------
        kp0 = _round_up(in_features, 128)
        self.tk = min(self.TK_TARGET, kp0)
        self.Kp = _round_up(kp0, self.tk)

        np0 = _round_up(out_features, 128)
        self.tn = min(self.TN_TARGET, np0)
        self.Np = _round_up(np0, self.tn)

        self.Rp = _round_up(r, 8)  # sublane-friendly rank, never tiled

        self._w_t_p = jnp.pad(self.w_t, ((0, self.Kp - in_features),
                                         (0, self.Np - out_features)))
        self._bias_p = jnp.pad(self.bias, (0, self.Np - out_features)
                               ).reshape(1, self.Np)
        self._a_t_p = jnp.pad(self.a_t, ((0, self.Kp - in_features),
                                         (0, self.Rp - r)))
        self._b_t_p = jnp.pad(self.b_t, ((0, self.Rp - r),
                                         (0, self.Np - out_features)))

    def __call__(self, x):
        # x: [..., in_features] (channels-last); flattened to [M, in_features].
        lead = x.shape[:-1]
        x2d = x.reshape(-1, self.in_features)
        M = x2d.shape[0]

        tm = min(self.TM_TARGET, _round_up(M, 8))
        Mp = _round_up(M, tm)

        x_p = jnp.pad(x2d, ((0, Mp - M), (0, self.Kp - self.in_features)))
        y_p = lora_linear(x_p, self._w_t_p, self._bias_p,
                          self._a_t_p, self._b_t_p,
                          tm=tm, tn=self.tn, tk=self.tk)
        y2d = y_p[:M, :self.out_features]
        return y2d.reshape(*lead, self.out_features)


if __name__ == "__main__":
    key = jax.random.PRNGKey(0)
    k_x, k_p = jax.random.split(key)

    # Small but tile-exercising shapes: grid = (1, 2, 2) with 256-class tiles.
    batch, seq, in_features, out_features, r = 2, 8, 512, 512, 4
    x = jax.random.normal(k_x, (batch, seq, in_features), jnp.float32)

    model = LoRAWrapperPallas(in_features, out_features, r, k_p)

    y = model(x)
    y = jax.block_until_ready(y)

    # Pure-JAX reference for sanity.
    x2d = x.reshape(-1, in_features)
    hi = jax.lax.Precision.HIGHEST
    ref2d = (jnp.dot(x2d, model.w_t, precision=hi) + model.bias
             + jnp.dot(jnp.dot(x2d, model.a_t, precision=hi),
                       model.b_t, precision=hi))
    ref = ref2d.reshape(batch, seq, out_features)

    assert y.shape == (batch, seq, out_features)
    assert jnp.allclose(y, ref, atol=1e-3, rtol=1e-3), \
        float(jnp.max(jnp.abs(y - ref)))

    print("KERNEL_OK")
</pallas_src>

<mosaic_0001>
module attributes {stable_mosaic.version = 11 : i64} {
  func.func @_lora_kernel(%arg0: i32, %arg1: i32, %arg2: i32, %arg3: memref<16x256xf32, #tpu.memory_space<vmem>>, %arg4: memref<256x256xf32, #tpu.memory_space<vmem>>, %arg5: memref<1x256xf32, #tpu.memory_space<vmem>>, %arg6: memref<256x8xf32, #tpu.memory_space<vmem>>, %arg7: memref<8x256xf32, #tpu.memory_space<vmem>>, %arg8: memref<16x256xf32, #tpu.memory_space<vmem>>, %arg9: memref<16x256xf32, #tpu.memory_space<vmem>>, %arg10: memref<16x8xf32, #tpu.memory_space<vmem>>) attributes {dimension_semantics = [#tpu.dimension_semantics<parallel>, #tpu.dimension_semantics<parallel>, #tpu.dimension_semantics<arbitrary>], iteration_bounds = array<i64: 1, 2, 2>, scalar_prefetch = 0 : i64, scratch_operands = 2 : i64, tpu.core_type = #tpu.core_type<tc>, window_params = [{transform_indices = @transform_0, window_bounds = array<i64: 16, 256>}, {transform_indices = @transform_1, window_bounds = array<i64: 256, 256>}, {transform_indices = @transform_2, window_bounds = array<i64: 1, 256>}, {transform_indices = @transform_3, window_bounds = array<i64: 256, 8>}, {transform_indices = @transform_4, window_bounds = array<i64: 8, 256>}, {transform_indices = @transform_5, window_bounds = array<i64: 16, 256>}]} {
    %c0_i32 = arith.constant 0 : i32
    %0 = arith.cmpi eq, %arg2, %c0_i32 : i32
    %1 = arith.extui %0 : i1 to i32
    %c0_i32_0 = arith.constant 0 : i32
    %2 = arith.cmpi ne, %1, %c0_i32_0 : i32
    scf.if %2 {
      %cst_16 = arith.constant 0.000000e+00 : f32
      %17 = vector.broadcast %cst_16 : f32 to vector<16x256xf32>
      %c0_17 = arith.constant 0 : index
      %c0_18 = arith.constant 0 : index
      %18 = vector.load %arg9[%c0_17, %c0_18] : memref<16x256xf32, #tpu.memory_space<vmem>>, vector<16x256xf32>
      tpu.vector_store %arg9[%c0_17, %c0_18], %17 {strides = array<i32>} : memref<16x256xf32, #tpu.memory_space<vmem>>, vector<16x256xf32>,
      %cst_19 = arith.constant 0.000000e+00 : f32
      %19 = vector.broadcast %cst_19 : f32 to vector<16x8xf32>
      %c0_20 = arith.constant 0 : index
      %c0_21 = arith.constant 0 : index
      %20 = vector.load %arg10[%c0_20, %c0_21] : memref<16x8xf32, #tpu.memory_space<vmem>>, vector<16x8xf32>
      tpu.vector_store %arg10[%c0_20, %c0_21], %19 {strides = array<i32>} : memref<16x8xf32, #tpu.memory_space<vmem>>, vector<16x8xf32>,
    } else {
    }
    %c0 = arith.constant 0 : index
    %c0_1 = arith.constant 0 : index
    %3 = vector.load %arg3[%c0, %c0_1] : memref<16x256xf32, #tpu.memory_space<vmem>>, vector<16x256xf32>
    %c0_2 = arith.constant 0 : index
    %c0_3 = arith.constant 0 : index
    %4 = vector.load %arg9[%c0_2, %c0_3] : memref<16x256xf32, #tpu.memory_space<vmem>>, vector<16x256xf32>
    %c0_4 = arith.constant 0 : index
    %c0_5 = arith.constant 0 : index
    %5 = vector.load %arg4[%c0_4, %c0_5] : memref<256x256xf32, #tpu.memory_space<vmem>>, vector<256x256xf32>
    %cst = arith.constant dense<0.000000e+00> : vector<16x256xf32>
    %6 = tpu.matmul %3, %5, %cst {dimension_numbers = #tpu.dot_dimension_numbers<[1], [0], [0], [1], [0, 0, 1, 1], [], []>} : vector<16x256xf32>, vector<256x256xf32>, vector<16x256xf32> -> vector<16x256xf32>
    %7 = arith.addf %4, %6 : vector<16x256xf32>
    %c0_6 = arith.constant 0 : index
    %c0_7 = arith.constant 0 : index
    %8 = vector.load %arg9[%c0_6, %c0_7] : memref<16x256xf32, #tpu.memory_space<vmem>>, vector<16x256xf32>
    tpu.vector_store %arg9[%c0_6, %c0_7], %7 {strides = array<i32>} : memref<16x256xf32, #tpu.memory_space<vmem>>, vector<16x256xf32>,
    %c0_8 = arith.constant 0 : index
    %c0_9 = arith.constant 0 : index
    %9 = vector.load %arg10[%c0_8, %c0_9] : memref<16x8xf32, #tpu.memory_space<vmem>>, vector<16x8xf32>
    %c0_10 = arith.constant 0 : index
    %c0_11 = arith.constant 0 : index
    %10 = vector.load %arg6[%c0_10, %c0_11] : memref<256x8xf32, #tpu.memory_space<vmem>>, vector<256x8xf32>
    %cst_12 = arith.constant dense<0.000000e+00> : vector<16x8xf32>
    %11 = tpu.matmul %3, %10, %cst_12 {dimension_numbers = #tpu.dot_dimension_numbers<[1], [0], [0], [1], [0, 0, 1, 1], [], []>} : vector<16x256xf32>, vector<256x8xf32>, vector<16x8xf32> -> vector<16x8xf32>
    %12 = arith.addf %9, %11 : vector<16x8xf32>
    %c0_13 = arith.constant 0 : index
    %c0_14 = arith.constant 0 : index
    %13 = vector.load %arg10[%c0_13, %c0_14] : memref<16x8xf32, #tpu.memory_space<vmem>>, vector<16x8xf32>
    tpu.vector_store %arg10[%c0_13, %c0_14], %12 {strides = array<i32>} : memref<16x8xf32, #tpu.memory_space<vmem>>, vector<16x8xf32>,
    %c1_i32 = arith.constant 1 : i32
    %14 = arith.cmpi eq, %arg2, %c1_i32 : i32
    %15 = arith.extui %14 : i1 to i32
    %c0_i32_15 = arith.constant 0 : i32
    %16 = arith.cmpi ne, %15, %c0_i32_15 : i32
    scf.if %16 {
      %c0_16 = arith.constant 0 : index
      %c0_17 = arith.constant 0 : index
      %17 = vector.load %arg10[%c0_16, %c0_17] : memref<16x8xf32, #tpu.memory_space<vmem>>, vector<16x8xf32>
      %c0_18 = arith.constant 0 : index
      %c0_19 = arith.constant 0 : index
      %18 = vector.load %arg7[%c0_18, %c0_19] : memref<8x256xf32, #tpu.memory_space<vmem>>, vector<8x256xf32>
      %cst_20 = arith.constant dense<0.000000e+00> : vector<16x256xf32>
      %19 = tpu.matmul %17, %18, %cst_20 {dimension_numbers = #tpu.dot_dimension_numbers<[1], [0], [0], [1], [0, 0, 1, 1], [], []>} : vector<16x8xf32>, vector<8x256xf32>, vector<16x256xf32> -> vector<16x256xf32>
      %c0_21 = arith.constant 0 : index
      %c0_22 = arith.constant 0 : index
      %20 = vector.load %arg9[%c0_21, %c0_22] : memref<16x256xf32, #tpu.memory_space<vmem>>, vector<16x256xf32>
      %21 = arith.addf %20, %19 : vector<16x256xf32>
      %c0_23 = arith.constant 0 : index
      %c0_24 = arith.constant 0 : index
      %22 = vector.load %arg5[%c0_23, %c0_24] : memref<1x256xf32, #tpu.memory_space<vmem>>, vector<1x256xf32>
      %23 = vector.broadcast %22 : vector<1x256xf32> to vector<16x256xf32>
      %24 = arith.addf %21, %23 : vector<16x256xf32>
      %c0_25 = arith.constant 0 : index
      %c0_26 = arith.constant 0 : index
      %25 = vector.load %arg8[%c0_25, %c0_26] : memref<16x256xf32, #tpu.memory_space<vmem>>, vector<16x256xf32>
      tpu.vector_store %arg8[%c0_25, %c0_26], %24 {strides = array<i32>} : memref<16x256xf32, #tpu.memory_space<vmem>>, vector<16x256xf32>,
    } else {
    }
    return
  }
  func.func @transform_0(%arg0: i32, %arg1: i32, %arg2: i32) -> (i32, i32) {
    %c0_i32 = arith.constant 0 : i32
    return %arg0, %arg2 : i32, i32
  }
  func.func @transform_1(%arg0: i32, %arg1: i32, %arg2: i32) -> (i32, i32) {
    %c0_i32 = arith.constant 0 : i32
    return %arg2, %arg1 : i32, i32
  }
  func.func @transform_2(%arg0: i32, %arg1: i32, %arg2: i32) -> (i32, i32) {
    %c0_i32 = arith.constant 0 : i32
    %c0_i32_0 = arith.constant 0 : i32
    return %c0_i32, %arg1 : i32, i32
  }
  func.func @transform_3(%arg0: i32, %arg1: i32, %arg2: i32) -> (i32, i32) {
    %c0_i32 = arith.constant 0 : i32
    %c0_i32_0 = arith.constant 0 : i32
    return %arg2, %c0_i32 : i32, i32
  }
  func.func @transform_4(%arg0: i32, %arg1: i32, %arg2: i32) -> (i32, i32) {
    %c0_i32 = arith.constant 0 : i32
    %c0_i32_0 = arith.constant 0 : i32
    return %c0_i32, %arg1 : i32, i32
  }
  func.func @transform_5(%arg0: i32, %arg1: i32, %arg2: i32) -> (i32, i32) {
    %c0_i32 = arith.constant 0 : i32
    return %arg0, %arg1 : i32, i32
  }
}

</mosaic_0001>

<bundles_post_ra>
// kernel: tpu_custom_call.1
= control target key start
LH: loop header
LB: loop body
LE: loop exit
PB: predicated region body
PF: predicated region fallthrough
CT: control target
= control target key end

     0   :  { %s1858_s0 = inlined_call_operand.vmem [shape: f32[16,512], index: 0, kind: input, shape index: {}]   ;;  %s1859_s1 = inlined_call_operand.hbm [shape: f32[512,512], index: 1, kind: input, shape index: {}]   ;;  %s1860_s2 = inlined_call_operand.vmem [shape: f32[1,512], index: 2, kind: input, shape index: {}]   ;;  %s1861_s3 = inlined_call_operand.vmem [shape: f32[512,8], index: 3, kind: input, shape index: {}]   ;;  %s1862_s4 = inlined_call_operand.vmem [shape: f32[8,512], index: 4, kind: input, shape index: {}]   ;;  %s1863_s5 = inlined_call_operand.hbm [shape: f32[16,512], index: 5, kind: output, shape index: {}]  }
   0x1   :  { %1871 = sst [smem:[#allocation18_spill]] %s1858_s0 }
   0x2   :  { %1872 = sst [smem:[#allocation19_spill]] %s1859_s1 }
   0x3   :  { %1873 = sst [smem:[#allocation20_spill]] %s1863_s5 }
   0x4   :  { %10 = vsyncpa [#allocation6], 0 }
   0x5   :  { %12 = vsyncpa [#allocation6 + $0x1], 0 }
   0x6   :  { %13 = vsyncpa [#allocation7], 0 }
   0x7   :  { %15 = vsyncpa [#allocation7 + $0x1], 0  ;;  %s1452_s18 = smov 0   ;;  %s1454_s19 = smov 0  }
   0x8   :  { %s1456_s20 = smov 0   ;;  %s1458_s21 = smov 0  }
   0x9   :  { %s1460_s22 = smov 0   ;;  %s1462_s23 = smov 0  }
   0xa   :  { %s1464_s24 = smov 0   ;;  %s1466_s25 = smov 0  }
   0xb   :  { %s1468_s26 = smov 0   ;;  %s1470_s27 = smov 0  }
   0xc   :  { %s1472_s28 = smov 0   ;;  %s1474_s29 = smov 0  }
   0xd   :  { %s1476_s30 = smov 0  }
   0xe LB: > { %1874 = sst [smem:[#allocation11_spill]] %s1390_s25  ;;  %s954_s6 = sadd.s32 4294967295, %s1410_s30   ;;  %s1410_s30 = sphi %s1476_s30, %s21_s30   ;;  %s1406_s29 = sphi %s1474_s29, %s1901_s29   ;;  %s1402_s28 = sphi %s1472_s28, %s1909_s28   ;;  %s1398_s27 = sphi %s1470_s27, %s1899_s27   ;;  %s1394_s26 = sphi %s1468_s26, %s1908_s26   ;;  %s1390_s25 = sphi %s1466_s25, %s1898_s25   ;;  %s1386_s24 = sphi %s1464_s24, %s1897_s24   ;;  %s1382_s23 = sphi %s1462_s23, %s1907_s23   ;;  %s1378_s22 = sphi %s1460_s22, %s1906_s22   ;;  %s1374_s21 = sphi %s1458_s21, %s1905_s21   ;;  %s1370_s20 = sphi %s1456_s20, %s1904_s20   ;;  %s1366_s19 = sphi %s1454_s19, %s1903_s19   ;;  %s1362_s18 = sphi %s1452_s18, %s1902_s18  }
   0xf   : > { %1875 = sst [smem:[#allocation12_spill]] %s1406_s29  ;;  %s33_s8 = sadd.s32 1, %s1402_s28 }
  0x10   : > { %s36_s9 = sadd.s32 1, %s1406_s29  ;;  %p34_p0 = scmp.ge.s32.totalorder %s33_s8, 2 }
  0x11   : > { %s49_s10 = sadd.s32 1, %s1390_s25  ;;  %p56_p1 = scmp.ne.s32.totalorder %s1390_s25, %s1386_s24 }
  0x12   : > { %p57_p2 = scmp.eq.s32.totalorder %s1410_s30, 0  ;;  %s1911_s8 = smov (%p34_p0, %s33_s8), 0 }
  0x13   : > { %1876 = sst [smem:[#allocation13_spill]] %s1911_s8  ;;  %s1913_s9 = smov (!%p34_p0, %s36_s9), %s1406_s29 }
  0x14   : > { %s45_s11 = ssub.s32 %s1402_s28, %s1911_s8  ;;  %p1530_p3 = por %p57_p2, %p56_p1 }
  0x15   : > { %p38_p4 = scmp.ge.s32.totalorder %s1913_s9, 2  ;;  %p47_p5 = scmp.eq.s32.totalorder %s45_s11, 0 }
  0x16   : > { %s77_s13 = sadd.s32 1, %s1382_s23  ;;  %p84_p6 = scmp.ne.s32.totalorder %s1382_s23, %s1378_s22 }
  0x17   : > { %s1915_s9 = smov (%p38_p4, %s1913_s9), 0  ;;  %p90_p8 = scmp.ne.s32.totalorder %s1378_s22, %s1374_s21 }
  0x18   : > { %1878 = sst [smem:[#allocation14_spill]] %s1915_s9  ;;  %s73_s15 = ssub.s32 %s1406_s29, %s1915_s9 }
  0x19   : > { %s1540_s14 = scalar_select %p47_p5, %s1390_s25, %s49_s10  }
  0x1a   : > { %p1544_p7 = por %p84_p6, %p57_p2  ;;  %s74_s17 = sor.u32 %s73_s15, %s45_s11 }
  0x1b   : > { %1879 = sst [smem:[#allocation15_spill]] %s1540_s14  ;;  %p75_p9 = scmp.eq.s32.totalorder %s74_s17, 0 }
  0x1c   : > { %p91_p10 = scmp.eq.s32.totalorder %s954_s6, 0  ;;  %p181_p11 = scmp.eq.s32.totalorder %s73_s15, 0 }
  0x1d   : > { %s183_s7 = sadd.s32 1, %s1370_s20  ;;  %p193_p13 = scmp.ne.s32.totalorder %s1370_s20, %s1366_s19 }
  0x1e   : > { %s1554_s8 = scalar_select %p75_p9, %s1382_s23, %s77_s13  }
  0x1f   : > { %p1556_p12 = por %p91_p10, %p90_p8  ;;  %p194_p0 = scmp.eq.s32.totalorder %s954_s6, 3 }
  0x20   : > { %1881 = sst [smem:[#allocation16_spill]] %s1554_s8  ;;  %p199_p1 = scmp.ne.s32.totalorder %s1366_s19, %s1362_s18 }
  0x21   : > { %s1563_s10 = scalar_select %p181_p11, %s1370_s20, %s183_s7  }
  0x22   : > { %s1884_s9 = sadd.s32 4294967294, %s1410_s30   ;;  %p1571_p4 = por %p194_p0, %p193_p13 }
  0x23   : > { %1883 = sst [smem:[#allocation17_spill]] %s1563_s10  ;;  %p200_p2 = scmp.eq.s32.totalorder %s1884_s9, 3 }
  0x24   : > { %s1885_s21 = scalar_select %p1571_p4, 1, 0 }
  0x25   : > { %p1575_p5 = por %p200_p2, %p199_p1  ;;  %p957_p6 = scmp.ge.s32.totalorder %s1410_s30, 4 }
  0x27   : > { %s1886_s11 = scalar_select %p1575_p5, 1, 0 }
  0x28   : > { %216 = sbr.rel (%p957_p6) target bundleno = 93 (0x5d), region = 16 }
  0x2f   : > { %219 = sbr.rel (!%p1530_p3) target bundleno = 59 (0x3b), region = 20  ;;  %s221_s6 = sand.u32 (%p1530_p3), 1, %s1390_s25  }
  0x30   : > { %s984_s7 = sshll.u32 (%p1530_p3), %s1402_s28, 4  ;;  %s958_s13 = sshll.u32 (%p1530_p3), %s221_s6, 5 }
  0x31   : > { %s1887_s0 = sld [smem:[#allocation18_spill]] (%p1530_p3)  ;;  %s223_s14 = scalar_lea.vmem (%p1530_p3), [#allocation4], %s958_s13 }
  0x37   : > { %s229_s17 = scalar_lea.vmem %s1887_s0, %s984_s7 }
  0x38   : > { %v242_v0 = vld [vmem:[%s229_s17] sm:$0xff]  ;;  %v244_v1 = vld [vmem:[%s229_s17 + $0x8] sm:$0xff] }
  0x39   : > { %v246_v2 = vld [vmem:[%s229_s17 + $0x20] sm:$0xff]  ;;  %243 = vst [vmem:[%s223_s14] sm:$0xff] %v242_v0  ;;  %245 = vst [vmem:[%s223_s14 + $0x8] sm:$0xff] %v244_v1  ;;  %v248_v3 = vld [vmem:[%s229_s17 + $0x28] sm:$0xff] }
  0x3a   : > { %247 = vst [vmem:[%s223_s14 + $0x10] sm:$0xff] %v246_v2  ;;  %249 = vst [vmem:[%s223_s14 + $0x18] sm:$0xff] %v248_v3 }
  0x3b PF: > { %s256_s12 = sand.u32 1, %s1382_s23   ;;  %s963_s6 = sshll.u32 %s1406_s29, 1 }
  0x3c   : > { %s961_s25 = sshll.u32 %s256_s12, 9  ;;  %s985_s8 = sshll.u32 %s1402_s28, 7 }
  0x3d   : > { %s267_s9 = sadd.s32 %s985_s8, %s963_s6  ;;  %s260_s7 = scalar_lea.vmem [#allocation5], %s961_s25 }
  0x3e   : > { %s270_s15 = sshll.u32 %s260_s7, 4  ;;  %s965_s0 = sshll.u32 %s267_s9, 7  ;;  %s1590_s15 = int_to_ptr.vmem [resolvable:$true] %s270_s15 }
  0x3f   : > { %s1888_s1 = sld [smem:[#allocation19_spill]]  ;;  %s1597_s14 = scalar_lea.sflag [#allocation6], %s256_s12 }
  0x45   : > { %s1595_s17 = scalar_lea.hbm %s1888_s1, %s965_s0  ;;  %s1248_s6 = scalar_lea.hbm %s1888_s1, 32768 }
  0x46   : > { %s1244_s29 = scalar_lea.hbm %s1595_s17, 8192  ;;  %p1249_p10 = scmp.lt.u32.totalorder %s1595_s17, %s1888_s1 }
  0x47   : > { %p1245_p3 = scmp.ne.s32.totalorder %s1595_s17, %s1244_s29  ;;  %p1250_p11 = scmp.lt.u32.totalorder %s1248_s6, %s1244_s29 }
  0x48   : > { %p1252_p0 = scmp.lt.u32.totalorder %s1244_s29, %s1595_s17 }
  0x49   : > { %p1246_p8 = pnand %p1245_p3, %p1544_p7  ;;  %p1251_p13 = por %p1250_p11, %p1249_p10 }
  0x4b   : > { %p1247_p9 = pneg %p1246_p8  ;;  %p1253_p1 = por %p1252_p0, %p1251_p13 }
  0x4d   : > { %p1254_p2 = pnand %p1253_p1, %p1247_p9 }
  0x4f   : > { %1257 = shalt.err (!%p1254_p2)
}
  0x50   : > { %s1258_s0 = scalar_lea.vmem %s1590_s15, 8192  ;;  %s1412_s10 = smov [#allocation5]  }
  0x51   : > { %p1259_p6 = scmp.ne.s32.totalorder %s1590_s15, %s1258_s0  ;;  %s1262_s12 = sshll.u32 %s1412_s10, 4  ;;  %s1263_s12 = int_to_ptr.vmem [resolvable:$false] %s1262_s12 }
  0x52   : > { %s1264_s13 = scalar_lea.vmem %s1263_s12, 16384  ;;  %p1265_p5 = scmp.lt.s32.totalorder %s1590_s15, %s1263_s12 }
  0x53   : > { %p1260_p3 = pnand %p1259_p6, %p1544_p7  ;;  %p1266_p4 = scmp.lt.s32.totalorder %s1264_s13, %s1258_s0 }
  0x55   : > { %p1261_p8 = pneg %p1260_p3  ;;  %p1267_p10 = por %p1266_p4, %p1265_p5 }
  0x57   : > { %p1268_p11 = pnand %p1267_p10, %p1261_p8 }
  0x59   : > { %1271 = shalt.err (!%p1268_p11)
}
  0x5a   : > { %s1413_s29 = smov 512   ;;  %s1414_s25 = smov 256  }
  0x5b   : > { %s1415_s8 = smov 16  }
  0x5c   : > { %1123 = dma.hbm_to_vmem [thread:$0]  (%p1544_p7), %s1595_s17, 8192, %s1590_s15, %s1597_s14, %s1413_s29, %s1414_s25, %s1415_s8  }
  0x5d PF: > { %p966_p9 = scmp.ge.s32.totalorder %s1410_s30, 1  ;;  %p304_p13 = scmp.lt.s32.totalorder %s1410_s30, 5 }
  0x5f   : > { %p305_p0 = pnand %p966_p9, %p304_p13 }
  0x60   : > { %s311_s6 = sand.u32 (!%p305_p0), 1, %s1386_s24   ;;  %s317_s9 = sand.u32 (!%p305_p0), 1, %s1378_s22  }
  0x61   : > { %308 = sbr.rel (%p305_p0) target bundleno = 646 (0x286), region = 59  ;;  %s967_s7 = sshll.u32 (!%p305_p0), %s311_s6, 5 }
  0x62   : > { %s968_s0 = sshll.u32 (!%p305_p0), %s317_s9, 9  ;;  %s1625_s10 = scalar_lea.vmem (!%p305_p0), [#allocation4], %s967_s7 }
  0x63   : > { %s318_s12 = scalar_lea.sflag (!%p305_p0), [#allocation6], %s317_s9  ;;  %s1627_s13 = scalar_lea.vmem (!%p305_p0), [#allocation5], %s968_s0 }
  0x68   : > { %1353 = dma.done.wait (%p1556_p12), %s318_s12, 8192  }
  0x69   : > { %1355 = vsyncadd (%p1556_p12), %s318_s12, 4294959104  ;;  %s1870_s16 = sand.u32 1, %s1366_s19   ;;  %s970_s15 = sshll.u32 %s1398_s27, 1 }
  0x6a   : > { %s969_s24 = sshll.u32 %s1870_s16, 5  ;;  %p371_p7 = scmp.lt.s32.totalorder %s970_s15, 3 }
  0x6b   : > { %s971_s17 = sshll.u32 %s1394_s26, 5  ;;  %s1655_s1 = scalar_lea.vmem [#allocation8], %s969_s24 }
  0x6c   : > { %s1917_s15 = smov (!%p371_p7, %s970_s15), 3  ;;  %p376_p4 = scmp.lt.s32.totalorder %s971_s17, 63 }
  0x6d   : > { %s373_s5 = scalar_lea.vmem %s1860_s2, %s1917_s15  ;;  %s974_s25 = sshll.u32 %s1917_s15, 3 }
  0x6e   : > { %s1919_s17 = smov (!%p376_p4, %s971_s17), 63  ;;  %s1648_s9 = scalar_lea.vmem %s1862_s4, %s974_s25 }
  0x6f   : > { %s972_s7 = sshll.u32 %s1919_s17, 3  ;;  %p975_p12 = scmp.ne.s32.totalorder %s1394_s26, 0 }
  0x70   : > { %s1653_s16 = scalar_lea.vmem %s1861_s3, %s972_s7  ;;  %vm397_vm0 = vcmask (!%p975_p12), 64512   ;;  %v1416_v4 = vmov (!%p975_p12), 0.0  }
  0x71   : > { %392 = sbr.rel (%p975_p12) target bundleno = 120 (0x78), region = 71  ;;  %393 = vst [vmem:[#allocation2] sm:$0xff] (!%p975_p12), %v1416_v4  ;;  %394 = vst [vmem:[#allocation2 + $0x8] sm:$0xff] (!%p975_p12), %v1416_v4 }
  0x72   : > { %395 = vst [vmem:[#allocation2 + $0x10] sm:$0xff] (!%p975_p12), %v1416_v4  ;;  %396 = vst [vmem:[#allocation2 + $0x18] sm:$0xff] (!%p975_p12), %v1416_v4 }
  0x73   : > { %398 = vst.msk [vmem:[#allocation3] sm:$0xff] (!%p975_p12), %vm397_vm0, %v1416_v4  ;;  %399 = vst.msk [vmem:[#allocation3 + $0x8] sm:$0xff] (!%p975_p12), %vm397_vm0, %v1416_v4 }
  0x78 PF: > { %v409_v5 = vld [vmem:[%s1627_s13 + $0x8] sm:$0xff]  ;;  %v411_v6 = vld [vmem:[%s1627_s13 + $0x18] sm:$0xff]  ;;  %v408_v7 = vld [vmem:[%s1627_s13] sm:$0xff]  ;;  %vm668_vm1 = vcmask 64512   ;;  %p976_p5 = scmp.ne.s32.totalorder %s1394_s26, 1 }
  0x79   : > { %v1025_v8 = vpack.c.bf16 %v411_v6, %v409_v5  ;;  %v410_v9 = vld [vmem:[%s1627_s13 + $0x10] sm:$0xff]  ;;  %v413_v10 = vld [vmem:[%s1627_s13 + $0x28] sm:$0xff]  ;;  %v415_v11 = vld [vmem:[%s1627_s13 + $0x38] sm:$0xff] }
  0x7a   : > { %v1027_v12 = vpack.c.bf16 %v410_v9, %v408_v7  ;;  %v1029_v13 = vpack.c.bf16 %v415_v11, %v413_v10  ;;  %v412_v14 = vld [vmem:[%s1627_s13 + $0x20] sm:$0xff]  ;;  %v414_v15 = vld [vmem:[%s1627_s13 + $0x30] sm:$0xff]  ;;  %v417_v16 = vld [vmem:[%s1627_s13 + $0x48] sm:$0xff] }
  0x7b   : > { %1026 = vmatprep.subr.bf16.mxu0 %v1025_v8  ;;  %v419_v17 = vld [vmem:[%s1627_s13 + $0x58] sm:$0xff]  ;;  %v1031_v18 = vpack.c.bf16 %v414_v15, %v412_v14  ;;  %v416_v20 = vld [vmem:[%s1627_s13 + $0x40] sm:$0xff]  ;;  %v418_v21 = vld [vmem:[%s1627_s13 + $0x50] sm:$0xff] }
  0x7c   : > { %1028 = vmatpush1.bf16.msra.mxu0 %v1027_v12  ;;  %v1033_v19 = vpack.c.bf16 %v419_v17, %v417_v16  ;;  %v421_v22 = vld [vmem:[%s1627_s13 + $0x68] sm:$0xff]  ;;  %v423_v23 = vld [vmem:[%s1627_s13 + $0x78] sm:$0xff]  ;;  %v1035_v24 = vpack.c.bf16 %v418_v21, %v416_v20  ;;  %v420_v26 = vld [vmem:[%s1627_s13 + $0x60] sm:$0xff] }
  0x7d   : > { %1030 = vmatprep.subr.bf16.mxu0 %v1029_v13  ;;  %v1037_v25 = vpack.c.bf16 %v423_v23, %v421_v22  ;;  %v422_v27 = vld [vmem:[%s1627_s13 + $0x70] sm:$0xff]  ;;  %v425_v28 = vld [vmem:[%s1627_s13 + $0x88] sm:$0xff]  ;;  %v427_v29 = vld [vmem:[%s1627_s13 + $0x98] sm:$0xff] }
  0x7e   : > { %v575_v30 = vld [vmem:[%s1653_s16 + $0x80] sm:$0xff]  ;;  %v576_v31 = vld [vmem:[%s1653_s16 + $0x88] sm:$0xff]  ;;  %v1039_v34 = vpack.c.bf16 %v422_v27, %v420_v26  ;;  %v424_v35 = vld [vmem:[%s1627_s13 + $0x80] sm:$0xff]  ;;  %v1041_v39 = vpack.c.bf16 %v427_v29, %v425_v28 }
  0x7f   : > { %v559_v32 = vld [vmem:[%s1653_s16] sm:$0xff]  ;;  %v560_v33 = vld [vmem:[%s1653_s16 + $0x8] sm:$0xff]  ;;  %v1089_v37 = vpack.c.bf16 %v576_v31, %v575_v30  ;;  %v429_v40 = vld [vmem:[%s1627_s13 + $0xa8] sm:$0xff] }
  0x80   : > { %1032 = vmatpush1.bf16.msra.mxu0 %v1031_v18  ;;  %v426_v36 = vld [vmem:[%s1627_s13 + $0x90] sm:$0xff]  ;;  %v1091_v38 = vpack.c.bf16 %v560_v33, %v559_v32  ;;  %v577_v41 = vld [vmem:[%s1653_s16 + $0x90] sm:$0xff]  ;;  %v578_v42 = vld [vmem:[%s1653_s16 + $0x98] sm:$0xff] }
  0x81   : > { %1034 = vmatprep.subr.bf16.mxu0 %v1033_v19  ;;  %v431_v43 = vld [vmem:[%s1627_s13 + $0xb8] sm:$0xff]  ;;  %1090 = vmatprep.subr.bf16.mxu1 %v1089_v37  ;;  %v1093_v44 = vpack.c.bf16 %v578_v42, %v577_v41  ;;  %v561_v45 = vld [vmem:[%s1653_s16 + $0x10] sm:$0xff]  ;;  %v562_v46 = vld [vmem:[%s1653_s16 + $0x18] sm:$0xff]  ;;  %v1043_v48 = vpack.c.bf16 %v426_v36, %v424_v35 }
  0x82   : > { %1092 = vmatpush3.bf16.msra.mxu1 %v1091_v38  ;;  %v1095_v47 = vpack.c.bf16 %v562_v46, %v561_v45  ;;  %v579_v49 = vld [vmem:[%s1653_s16 + $0xa0] sm:$0xff]  ;;  %v580_v50 = vld [vmem:[%s1653_s16 + $0xa8] sm:$0xff]  ;;  %v1045_v52 = vpack.c.bf16 %v431_v43, %v429_v40  ;;  %v428_v53 = vld [vmem:[%s1627_s13 + $0xa0] sm:$0xff] }
  0x83   : > { %1094 = vmatprep.subr.bf16.mxu1 %v1093_v44  ;;  %v563_v51 = vld [vmem:[%s1653_s16 + $0x20] sm:$0xff]  ;;  %v1097_v55 = vpack.c.bf16 %v580_v50, %v579_v49  ;;  %v564_v56 = vld [vmem:[%s1653_s16 + $0x28] sm:$0xff]  ;;  %v433_v57 = vld [vmem:[%s1627_s13 + $0xc8] sm:$0xff] }
  0x84   : > { %1036 = vmatpush1.bf16.msra.mxu0 %v1035_v24  ;;  %v430_v54 = vld [vmem:[%s1627_s13 + $0xb0] sm:$0xff]  ;;  %v435_v58 = vld [vmem:[%s1627_s13 + $0xd8] sm:$0xff]  ;;  %v581_v59 = vld [vmem:[%s1653_s16 + $0xb0] sm:$0xff]  ;;  %v1099_v60 = vpack.c.bf16 %v564_v56, %v563_v51 }
  0x85   : > { %1038 = vmatprep.subr.bf16.mxu0 %v1037_v25  ;;  %v582_v61 = vld [vmem:[%s1653_s16 + $0xb8] sm:$0xff]  ;;  %v1047_v62 = vpack.c.bf16 %v430_v54, %v428_v53  ;;  %v432_v63 = vld [vmem:[%s1627_s13 + $0xc0] sm:$0xff]  ;;  %v1049_v3 = vpack.c.bf16 %v435_v58, %v433_v57  ;;  %v434_v4 = vld [vmem:[%s1627_s13 + $0xd0] sm:$0xff] }
  0x86   : > { %1096 = vmatpush3.bf16.msra.mxu1 %v1095_v47  ;;  %v1101_v0 = vpack.c.bf16 %v582_v61, %v581_v59  ;;  %v565_v1 = vld [vmem:[%s1653_s16 + $0x30] sm:$0xff]  ;;  %v566_v2 = vld [vmem:[%s1653_s16 + $0x38] sm:$0xff]  ;;  %v583_v5 = vld [vmem:[%s1653_s16 + $0xc0] sm:$0xff]  ;;  %v1051_v10 = vpack.c.bf16 %v434_v4, %v432_v63 }
  0x87   : > { %1098 = vmatprep.subr.bf16.mxu1 %v1097_v55  ;;  %v584_v6 = vld [vmem:[%s1653_s16 + $0xc8] sm:$0xff]  ;;  %v437_v7 = vld [vmem:[%s1627_s13 + $0xe8] sm:$0xff]  ;;  %v1103_v9 = vpack.c.bf16 %v566_v2, %v565_v1  ;;  %v436_v11 = vld [vmem:[%s1627_s13 + $0xe0] sm:$0xff] }
  0x88   : > { %1040 = vmatpush1.bf16.msra.mxu0 %v1039_v34  ;;  %v439_v8 = vld [vmem:[%s1627_s13 + $0xf8] sm:$0xff]  ;;  %v1105_v12 = vpack.c.bf16 %v584_v6, %v583_v5  ;;  %v567_v13 = vld [vmem:[%s1653_s16 + $0x40] sm:$0xff]  ;;  %v585_v17 = vld [vmem:[%s1653_s16 + $0xd0] sm:$0xff] }
  0x89   : > { %1042 = vmatprep.subr.bf16.mxu0 %v1041_v39  ;;  %v568_v14 = vld [vmem:[%s1653_s16 + $0x48] sm:$0xff]  ;;  %v1053_v15 = vpack.c.bf16 %v439_v8, %v437_v7  ;;  %v438_v16 = vld [vmem:[%s1627_s13 + $0xf0] sm:$0xff]  ;;  %v586_v18 = vld [vmem:[%s1653_s16 + $0xd8] sm:$0xff] }
  0x8a   : > { %1100 = vmatpush3.bf16.msra.mxu1 %v1099_v60  ;;  %v441_v19 = vld [vmem:[%s1627_s13 + $0x108] sm:$0xff]  ;;  %v443_v20 = vld [vmem:[%s1627_s13 + $0x118] sm:$0xff]  ;;  %v1107_v21 = vpack.c.bf16 %v568_v14, %v567_v13  ;;  %v1055_v22 = vpack.c.bf16 %v438_v16, %v436_v11  ;;  %v440_v23 = vld [vmem:[%s1627_s13 + $0x100] sm:$0xff]  ;;  %v1109_v24 = vpack.c.bf16 %v586_v18, %v585_v17 }
  0x8b   : > { %1102 = vmatprep.subr.bf16.mxu1 %v1101_v0  ;;  %v569_v25 = vld [vmem:[%s1653_s16 + $0x50] sm:$0xff]  ;;  %v570_v26 = vld [vmem:[%s1653_s16 + $0x58] sm:$0xff]  ;;  %v1057_v27 = vpack.c.bf16 %v443_v20, %v441_v19  ;;  %v442_v28 = vld [vmem:[%s1627_s13 + $0x110] sm:$0xff] }
  0x8c   : > { %1044 = vmatpush1.bf16.msra.mxu0 %v1043_v48  ;;  %v587_v29 = vld [vmem:[%s1653_s16 + $0xe0] sm:$0xff]  ;;  %v588_v30 = vld [vmem:[%s1653_s16 + $0xe8] sm:$0xff]  ;;  %v445_v31 = vld [vmem:[%s1627_s13 + $0x128] sm:$0xff]  ;;  %v1111_v33 = vpack.c.bf16 %v570_v26, %v569_v25  ;;  %v1059_v35 = vpack.c.bf16 %v442_v28, %v440_v23 }
  0x8d   : > { %1046 = vmatprep.subr.bf16.mxu0 %v1045_v52  ;;  %v447_v32 = vld [vmem:[%s1627_s13 + $0x138] sm:$0xff]  ;;  %v401_v34 = vld [vmem:[%s1625_s10 + $0x8] sm:$0xff]  ;;  %v444_v36 = vld [vmem:[%s1627_s13 + $0x120] sm:$0xff]  ;;  %v1113_v37 = vpack.c.bf16 %v588_v30, %v587_v29 }
  0x8e   : > { %1104 = vmatpush3.bf16.msra.mxu1 %v1103_v9  ;;  %v571_v38 = vld [vmem:[%s1653_s16 + $0x60] sm:$0xff]  ;;  %v572_v39 = vld [vmem:[%s1653_s16 + $0x68] sm:$0xff]  ;;  %v1061_v40 = vpack.c.bf16 %v447_v32, %v445_v31  ;;  %v589_v42 = vld [vmem:[%s1653_s16 + $0xf0] sm:$0xff]  ;;  %655 = vmatprep.mubr.f32.mxu1 %v401_v34 }
  0x8f   : > { %1106 = vmatprep.subr.bf16.mxu1 %v1105_v12  ;;  %v446_v41 = vld [vmem:[%s1627_s13 + $0x130] sm:$0xff]  ;;  %v590_v43 = vld [vmem:[%s1653_s16 + $0xf8] sm:$0xff]  ;;  %v451_v45 = vld [vmem:[%s1627_s13 + $0x158] sm:$0xff]  ;;  %536 = vmatprep.mubr.f32.mxu0 %v401_v34  ;;  %v1115_v46 = vpack.c.bf16 %v572_v39, %v571_v38 }
  0x90   : > { %1048 = vmatpush1.bf16.msra.mxu0 %v1047_v62  ;;  %v449_v44 = vld [vmem:[%s1627_s13 + $0x148] sm:$0xff]  ;;  %v1063_v47 = vpack.c.bf16 %v446_v41, %v444_v36  ;;  %v1117_v48 = vpack.c.bf16 %v590_v43, %v589_v42  ;;  %v573_v49 = vld [vmem:[%s1653_s16 + $0x70] sm:$0xff]  ;;  %v450_v53 = vld [vmem:[%s1627_s13 + $0x150] sm:$0xff] }
  0x91   : > { %1050 = vmatprep.subr.bf16.mxu0 %v1049_v3  ;;  %v574_v50 = vld [vmem:[%s1653_s16 + $0x78] sm:$0xff]  ;;  %v1065_v51 = vpack.c.bf16 %v451_v45, %v449_v44  ;;  %v448_v52 = vld [vmem:[%s1627_s13 + $0x140] sm:$0xff]  ;;  %v455_v55 = vld [vmem:[%s1627_s13 + $0x178] sm:$0xff] }
  0x92   : > { %1108 = vmatpush3.bf16.msra.mxu1 %v1107_v21  ;;  %v453_v54 = vld [vmem:[%s1627_s13 + $0x168] sm:$0xff]  ;;  %v1119_v56 = vpack.c.bf16 %v574_v50, %v573_v49  ;;  %v1067_v57 = vpack.c.bf16 %v450_v53, %v448_v52  ;;  %v452_v59 = vld [vmem:[%s1627_s13 + $0x160] sm:$0xff]  ;;  %v454_v60 = vld [vmem:[%s1627_s13 + $0x170] sm:$0xff]  ;;  %v772_v52 = vlaneseq (!%p976_p5) }
  0x93   : > { %1110 = vmatprep.subr.bf16.mxu1 %v1109_v24  ;;  %v1069_v58 = vpack.c.bf16 %v455_v55, %v453_v54  ;;  %v457_v61 = vld [vmem:[%s1627_s13 + $0x188] sm:$0xff]  ;;  %v459_v62 = vld [vmem:[%s1627_s13 + $0x198] sm:$0xff]  ;;  %v400_v63 = vld [vmem:[%s1625_s10] sm:$0xff]  ;;  %v1071_v0 = vpack.c.bf16 %v454_v60, %v452_v59 }
  0x94   : > { %1052 = vmatpush1.bf16.msra.mxu0 %v1051_v10  ;;  %v403_v1 = vld [vmem:[%s1625_s10 + $0x18] sm:$0xff]  ;;  %v1073_v2 = vpack.c.bf16 %v459_v62, %v457_v61  ;;  %v456_v3 = vld [vmem:[%s1627_s13 + $0x180] sm:$0xff]  ;;  %v458_v4 = vld [vmem:[%s1627_s13 + $0x190] sm:$0xff]  ;;  %v773_v53 = vshrl.u32 (!%p976_p5), %v772_v52, 7 }
  0x95   : > { %1054 = vmatprep.subr.bf16.mxu0 %v1053_v15  ;;  %v461_v5 = vld [vmem:[%s1627_s13 + $0x1a8] sm:$0xff]  ;;  %v463_v6 = vld [vmem:[%s1627_s13 + $0x1b8] sm:$0xff]  ;;  %v402_v7 = vld [vmem:[%s1625_s10 + $0x10] sm:$0xff]  ;;  %v1075_v8 = vpack.c.bf16 %v458_v4, %v456_v3 }
  0x96   : > { %1112 = vmatpush3.bf16.msra.mxu1 %v1111_v33  ;;  %v1077_v9 = vpack.c.bf16 %v463_v6, %v461_v5  ;;  %v460_v10 = vld [vmem:[%s1627_s13 + $0x1a0] sm:$0xff]  ;;  %v462_v11 = vld [vmem:[%s1627_s13 + $0x1b0] sm:$0xff]  ;;  %v465_v12 = vld [vmem:[%s1627_s13 + $0x1c8] sm:$0xff]  ;;  %v774_v54 = vsub.s32 (!%p976_p5), 0, %v773_v53 }
  0x97   : > { %1114 = vmatprep.subr.bf16.mxu1 %v1113_v37  ;;  %v467_v13 = vld [vmem:[%s1627_s13 + $0x1d8] sm:$0xff]  ;;  %v1079_v14 = vpack.c.bf16 %v462_v11, %v460_v10  ;;  %v464_v16 = vld [vmem:[%s1627_s13 + $0x1c0] sm:$0xff]  ;;  %v466_v17 = vld [vmem:[%s1627_s13 + $0x1d0] sm:$0xff] }
  0x98   : > { %1056 = vmatpush1.bf16.msra.mxu0 %v1055_v22  ;;  %v1081_v15 = vpack.c.bf16 %v467_v13, %v465_v12  ;;  %v469_v18 = vld [vmem:[%s1627_s13 + $0x1e8] sm:$0xff]  ;;  %v471_v19 = vld [vmem:[%s1627_s13 + $0x1f8] sm:$0xff]  ;;  %v1083_v20 = vpack.c.bf16 %v466_v17, %v464_v16  ;;  %v468_v22 = vld [vmem:[%s1627_s13 + $0x1e0] sm:$0xff] }
  0x99   : > { %1058 = vmatprep.subr.bf16.mxu0 %v1057_v27  ;;  %v1085_v21 = vpack.c.bf16 %v471_v19, %v469_v18  ;;  %v470_v23 = vld [vmem:[%s1627_s13 + $0x1f0] sm:$0xff]  ;;  %v558_v31 = vld [vmem:[#allocation3 + $0x8] sm:$0xff]  ;;  %v406_v41 = vld [vmem:[#allocation2 + $0x10] sm:$0xff] }
  0x9a   : > { %1116 = vmatpush3.bf16.msra.mxu1 %v1115_v46  ;;  %v1087_v24 = vpack.c.bf16 %v470_v23, %v468_v22  ;;  %v557_v26 = vld [vmem:[#allocation3] sm:$0xff]  ;;  %v405_v36 = vld [vmem:[#allocation2 + $0x8] sm:$0xff]  ;;  %v407_v42 = vld [vmem:[#allocation2 + $0x18] sm:$0xff] }
  0x9b   : > { %1118 = vmatprep.subr.bf16.mxu1 %v1117_v48  ;;  %v677_v48 = vld [vmem:[%s1648_s9] sm:$0xff] (!%p976_p5) }
  0x9c   : > { %1060 = vmatpush1.bf16.msra.mxu0 %v1059_v35  ;;  %v404_v35 = vld [vmem:[#allocation2] sm:$0xff] }
  0x9d   : > { %1062 = vmatprep.subr.bf16.mxu0 %v1061_v40  ;;  %v770_v55 = vld [vmem:[%s373_s5] sm:$0x3] (!%p976_p5) }
  0x9e   : > { %1120 = vmatpush3.bf16.msra.mxu1 %v1119_v56  ;;  %v778_v56 = vsub.s32 (!%p976_p5), 1, %v773_v53  ;;  %v775_v59 = vrot.slane (!%p976_p5), %v770_v55, %v774_v54 }
  0xa0   : > { %1064 = vmatpush1.bf16.msra.mxu0 %v1063_v47  ;;  %v678_v47 = vld [vmem:[%s1648_s9 + $0x8] sm:$0xff] (!%p976_p5) }
  0xa1   : > { %1066 = vmatprep.subr.bf16.mxu0 %v1065_v51  ;;  %656 = vmatmul.mubr.f32.vlgmr.msra.gmra.mrb[0].mxu1 %v400_v63  ;;  %v1417_v51 = vmov (!%p976_p5), 0.0  }
  0xa2   : > { %660 = vmatprep.mubr.f32.mxu1 %v403_v1  ;;  %1121 = vmatprep.subr.mxu1 (!%p976_p5), %v678_v47 }
  0xa3   : > { %1122 = vmatpush1.msra.mxu1 (!%p976_p5), %v677_v48 }
  0xa4   : > { %1068 = vmatpush1.bf16.msra.mxu0 %v1067_v57 }
  0xa5   : > { %1070 = vmatprep.subr.bf16.mxu0 %v1069_v58  ;;  %661 = vmatmul.mubr.f32.gmra.mrb[2].mxu1 %v402_v7 }
  0xa6   : > { %755 = vmatprep.mubr.f32.mxu1 (!%p976_p5), %v1417_v51 }
  0xa8   : > { %1072 = vmatpush1.bf16.msra.mxu0 %v1071_v0  ;;  %v779_v0 = vrot.slane (!%p976_p5), %v770_v55, %v778_v56 }
  0xa9   : > { %1074 = vmatprep.subr.bf16.mxu0 %v1073_v2 }
  0xac   : > { %1076 = vmatpush1.bf16.msra.mxu0 %v1075_v8 }
  0xad   : > { %1078 = vmatprep.subr.bf16.mxu0 %v1077_v9 }
  0xb0   : > { %1080 = vmatpush1.bf16.msra.mxu0 %v1079_v14 }
  0xb1   : > { %1082 = vmatprep.subr.bf16.mxu0 %v1081_v15 }
  0xb4   : > { %1084 = vmatpush1.bf16.msra.mxu0 %v1083_v20 }
  0xb5   : > { %1086 = vmatprep.subr.bf16.mxu0 %v1085_v21 }
  0xb8   : > { %1088 = vmatpush1.bf16.msra.mxu0 %v1087_v24 }
  0xb9   : > { %685 = vmatprep.subr.mxu0 (!%p976_p5), %v678_v47 }
  0xbb   : > { %537 = vmatmul.mubr.f32.vlgmr.msra.gmra.mrb[0].mxu0 %v400_v63 }
  0xbc   : > { %542 = vmatprep.mubr.f32.mxu0 %v403_v1  ;;  %686 = vmatpush1.msra.mxu0 (!%p976_p5), %v677_v48 }
  0xbf   : > { %543 = vmatmul.mubr.f32.gmra.mrb[2].mxu0 %v402_v7 }
  0xc0   : > { %749 = vmatprep.mubr.f32.mxu0 (!%p976_p5), %v1417_v51 }
 0x174   : > { %v1019_v25 = vpop.f32.mrb[0].mxu1 }
 0x175   : > { %v1020_v27 = vpop.f32.mrb[1].mxu1 }
 0x176   : > { %v1021_v28 = vadd.f32 %v1020_v27, %v1019_v25 }
 0x178   : > { %v666_v29 = vadd.f32 %v1021_v28, %v557_v26  ;;  %v1022_v30 = vpop.f32.mrb[2].mxu1 }
 0x179   : > { %v1023_v32 = vpop.f32.mrb[3].mxu1 }
 0x17a   : > { %669 = vst.msk [vmem:[#allocation3] sm:$0xff] %vm668_vm1, %v666_v29  ;;  %v1024_v33 = vadd.f32 %v1023_v32, %v1022_v30 }
 0x17c   : > { %v667_v34 = vadd.f32 %v1024_v33, %v558_v31 }
 0x17e   : > { %670 = vst.msk [vmem:[#allocation3 + $0x8] sm:$0xff] %vm668_vm1, %v667_v34 }
 0x181   : > { %v675_v49 = vld [vmem:[#allocation3] sm:$0xff] (!%p976_p5) }
 0x185   : > { %v676_v50 = vld [vmem:[#allocation3 + $0x8] sm:$0xff] (!%p976_p5) }
 0x186   : > { %978 = vmatmul.mubr.msk.f32.vlgmr.msra.gmra.mrb[0].mxu1 (!%p976_p5), %vm668_vm1, %v676_v50 }
 0x18e   : > { %v538_v37 = vpop.f32.mrb[0].mxu0 }
 0x18f   : > { %v549_v38 = vadd.f32 %v538_v37, %v404_v35  ;;  %v540_v39 = vpop.f32.mrb[1].mxu0  ;;  %977 = vmatmul.mubr.msk.f32.vlgmr.msra.gmra.mrb[0].mxu0 (!%p976_p5), %vm668_vm1, %v675_v49 }
 0x190   : > { %v550_v40 = vadd.f32 %v540_v39, %v405_v36  ;;  %674 = sbr.rel (%p976_p5) target bundleno = 617 (0x269), region = 75 }
 0x191   : > { %553 = vst [vmem:[#allocation2] sm:$0xff] %v549_v38 }
 0x192   : > { %554 = vst [vmem:[#allocation2 + $0x8] sm:$0xff] %v550_v40  ;;  %v544_v43 = vpop.f32.mrb[2].mxu0 }
 0x193   : > { %v551_v44 = vadd.f32 %v544_v43, %v406_v41  ;;  %v546_v45 = vpop.f32.mrb[3].mxu0 }
 0x194   : > { %v552_v46 = vadd.f32 %v546_v45, %v407_v42 }
 0x195   : > { %555 = vst [vmem:[#allocation2 + $0x10] sm:$0xff] %v551_v44 }
 0x196   : > { %556 = vst [vmem:[#allocation2 + $0x18] sm:$0xff] %v552_v46 }
 0x198   : > { %v762_v57 = vld [vmem:[#allocation2] sm:$0xff] }
 0x199   : > { %v763_v60 = vld [vmem:[#allocation2 + $0x8] sm:$0xff] }
 0x19c   : > { %v764_v58 = vld [vmem:[#allocation2 + $0x10] sm:$0xff] }
 0x19d   : > { %v765_v61 = vld [vmem:[#allocation2 + $0x18] sm:$0xff] }
 0x259   : > { %v757_v63 = vpop.f32.mrb[0].mxu1 }
 0x25a   : > { %v768_v2 = vadd.f32 %v764_v58, %v757_v63  ;;  %v759_v4 = vpop.f32.mrb[1].mxu1 }
 0x25b   : > { %v769_v6 = vadd.f32 %v765_v61, %v759_v4 }
 0x25c   : > { %v784_v8 = vadd.f32 %v775_v59, %v768_v2 }
 0x25d   : > { %v785_v10 = vadd.f32 %v779_v0, %v769_v6 }
 0x25e   : > { %788 = vst [vmem:[%s1655_s1 + $0x10] sm:$0xff] %v784_v8 }
 0x25f   : > { %789 = vst [vmem:[%s1655_s1 + $0x18] sm:$0xff] %v785_v10 }
 0x262   : > { %v751_v62 = vpop.f32.mrb[0].mxu0 }
 0x263   : > { %v766_v1 = vadd.f32 %v762_v57, %v751_v62  ;;  %v753_v3 = vpop.f32.mrb[1].mxu0 }
 0x264   : > { %v767_v5 = vadd.f32 %v763_v60, %v753_v3 }
 0x265   : > { %v782_v7 = vadd.f32 %v775_v59, %v766_v1 }
 0x266   : > { %v783_v9 = vadd.f32 %v779_v0, %v767_v5 }
 0x267   : > { %786 = vst [vmem:[%s1655_s1] sm:$0xff] %v782_v7 }
 0x268   : > { %787 = vst [vmem:[%s1655_s1 + $0x8] sm:$0xff] %v783_v9 }
 0x269 PF: > { %s986_s13 = sshll.u32 %s1398_s27, 8  ;;  %s1889_s24 = sld [smem:[#allocation20_spill]] }
 0x26a   : > { %s807_s29 = sshll.u32 %s1655_s1, 4  ;;  %s1891_s5 = sand.u32 1, %s1366_s19   ;;  %s1781_s29 = int_to_ptr.vmem [resolvable:$true] %s807_s29 }
 0x26b   : > { %s1785_s25 = scalar_lea.sflag [#allocation7], %s1891_s5  ;;  %s1272_s8 = scalar_lea.vmem %s1781_s29, 512 }
 0x26c   : > { %p1273_p1 = scmp.ne.s32.totalorder %s1781_s29, %s1272_s8  ;;  %p1892_p2 = scmp.ne.s32.totalorder %s1885_s21, 0 }
 0x26d   : > { %s1418_s27 = smov [#allocation8]  }
 0x26e   : > { %p1274_p6 = pnand %p1273_p1, %p1892_p2  ;;  %s1276_s6 = sshll.u32 %s1418_s27, 4  ;;  %s1277_s6 = int_to_ptr.vmem [resolvable:$false] %s1276_s6 }
 0x26f   : > { %s1890_s17 = smov %s1889_s24  ;;  %s1778_s14 = scalar_lea.hbm %s1889_s24, %s986_s13 }
 0x270   : > { %p1275_p3 = pneg %p1274_p6  ;;  %s1278_s9 = scalar_lea.vmem %s1277_s6, 1024 }
 0x271   : > { %p1279_p8 = scmp.lt.s32.totalorder %s1781_s29, %s1277_s6  ;;  %p1280_p10 = scmp.lt.s32.totalorder %s1278_s9, %s1272_s8 }
 0x273   : > { %p1281_p11 = por %p1280_p10, %p1279_p8 }
 0x275   : > { %p1282_p9 = pnand %p1281_p11, %p1275_p3 }
 0x277   : > { %1285 = shalt.err (!%p1282_p9)
}
 0x278   : > { %s1286_s1 = scalar_lea.hbm %s1778_s14, 512  ;;  %s1290_s12 = scalar_lea.hbm %s1890_s17, 1024 }
 0x279   : > { %p1287_p13 = scmp.ne.s32.totalorder %s1778_s14, %s1286_s1  ;;  %p1291_p4 = scmp.lt.u32.totalorder %s1778_s14, %s1890_s17 }
 0x27a   : > { %p1292_p12 = scmp.lt.u32.totalorder %s1290_s12, %s1286_s1  ;;  %p1294_p1 = scmp.lt.u32.totalorder %s1286_s1, %s1778_s14 }
 0x27b   : > { %p1288_p0 = pnand %p1287_p13, %p1892_p2 }
 0x27c   : > { %p1293_p5 = por %p1292_p12, %p1291_p4 }
 0x27d   : > { %p1289_p7 = pneg %p1288_p0 }
 0x27e   : > { %p1295_p6 = por %p1294_p1, %p1293_p5 }
 0x280   : > { %p1296_p3 = pnand %p1295_p6, %p1289_p7 }
 0x282   : > { %1299 = shalt.err (!%p1296_p3)
}
 0x283   : > { %s1419_s13 = smov 256   ;;  %s1420_s16 = smov 512  }
 0x284   : > { %s1421_s15 = smov 16  }
 0x285   : > { %1125 = dma.vmem_to_hbm [thread:$0]  (%p1892_p2), %s1781_s29, 512, %s1778_s14, %s1785_s25, %s1419_s13, %s1420_s16, %s1421_s15  }
 0x286 PF: > { %p1131_p8 = scmp.ge.s32.totalorder %s1410_s30, 2  ;;  %s822_s24 = sand.u32 1, %s1362_s18  }
 0x287   : > { %p1893_p10 = scmp.ne.s32.totalorder %s1886_s11, 0  ;;  %s823_s5 = scalar_lea.sflag [#allocation7], %s822_s24 }
 0x289   : > { %p1128_p11 = pnand %p1131_p8, %p1893_p10 }
 0x28b   : > { %1357 = dma.done.wait (!%p1128_p11), %s823_s5, 512  }
 0x28c   : > { %1359 = vsyncadd (!%p1128_p11), %s823_s5, 4294966784  ;;  %s21_s30 = sadd.s32 1, %s1410_s30   ;;  %s1895_s21 = sld [smem:[#allocation17_spill]] }
 0x28d   : > { %p1814_p9 = scmp.ge.s32.totalorder %s21_s30, 6   ;;  %s1896_s14 = sld [smem:[#allocation16_spill]] }
 0x28e   : > { %s1897_s24 = sld [smem:[#allocation11_spill]]  ;;  %s1898_s25 = sld [smem:[#allocation15_spill]] }
 0x28f   : > { %s1899_s27 = sld [smem:[#allocation12_spill]]  ;;  %s1900_s11 = sld [smem:[#allocation13_spill]] }
 0x290   : > { %s1901_s29 = sld [smem:[#allocation14_spill]]  ;;  %s1902_s18 = smov %s1366_s19 }
 0x291   : > { %s1903_s19 = smov %s1370_s20  ;;  %s1908_s26 = smov %s1402_s28 }
 0x292   : > { %s1904_s20 = smov %s1895_s21  ;;  %s1905_s21 = smov %s1378_s22 }
 0x293   : > { %s1906_s22 = smov %s1382_s23  ;;  %s1907_s23 = smov %s1896_s14 }
 0x294   :  { %20 = sbr.rel (!%p1814_p9) target bundleno = 14 (0xe), region = 133 }
 0x295   : > { %s1909_s28 = smov %s1900_s11 }
 0x29b   :  { %828 = vsyncpa [#allocation6], 1 }
 0x29c   :  { %830 = vsyncpa [#allocation6 + $0x1], 1 }
 0x29d   :  { %831 = vsyncpa [#allocation7], 1 }
 0x29e   :  { %833 = vsyncpa [#allocation7 + $0x1], 1 }

</bundles_post_ra>
